<compile_context>
chip_gen: v7x
topology: tpu7x:2x2x1
jax: 0.10.0
libtpu: 0.0.40
codegen_flags: <defaults>
</compile_context>

<pallas_src>
import functools

import jax
import jax.numpy as jnp
from jax.experimental import pallas as pl
from jax.experimental.pallas import tpu as pltpu


def _round_up(x, m):
    return (x + m - 1) // m * m


def rnn_wavefront_kernel(x_ref, w_ref, out_ref, *, seq_len, batch, e_pad,
                         hidden, classes):
    S, B, H, C = seq_len, batch, hidden, classes
    H2 = 2 * H
    f32 = jnp.float32

    # Static, 8-aligned row offsets inside the packed parameter slab.
    o_wih = 0
    o_wbig = o_wih + e_pad
    o_wlin = o_wbig + H2
    o_bias = o_wlin + H2

    wih0pad = w_ref[o_wih:o_wih + e_pad, :]   # (Ep, 2H) = [W_ih0^T | 0]
    wbig = w_ref[o_wbig:o_wbig + H2, :]       # (2H, 2H) = [[Whh0^T, Wih1^T],[0, Whh1^T]]
    wlinsq = w_ref[o_wlin:o_wlin + H2, :]     # (2H, 2H): W_lin^T in rows[H:], cols[:C]
    bias = w_ref[o_bias:o_bias + 8, :]        # (8, 2H) aligned load; rows sliced below
    bcat = bias[0:1, :]                       # (1, 2H) = [b_ih0 + b_hh0 | b_ih1 + b_hh1]
    b1pad = bias[1:2, :]                      # (1, 2H) = [0 | b_ih1 + b_hh1]
    blinpad = bias[2:3, :]                    # (1, 2H) = [b_lin | 0]

    # One MXU push: per-step additive term [xproj_t + b0 | b1] for all t.
    addend = (jnp.dot(x_ref[...], wih0pad, preferred_element_type=f32)
              + bcat)                         # (S*B, 2H)

    def superstep(s, add_t):
        # s_t = tanh(s_{t-1} @ W_big + add_t); one dot + one tanh.
        return jnp.tanh(jnp.dot(s, wbig, preferred_element_type=f32) + add_t)

    # t = 0: s_0 = [h0_0 | h1_{-1}] = [tanh(xproj_0 + b0) | tanh(0)] .
    s = jnp.tanh(addend[0:B, :] - b1pad)

    # t = 1 .. S-1: wavefront super-steps, no lane shuffles in the loop.
    if S <= 32:
        for t in range(1, S):                 # tiny static S -> full unroll
            s = superstep(s, addend[t * B:(t + 1) * B, :])
    else:
        # Long-sequence path: bounded code size / vreg live ranges.
        def body(t, s_carry):
            add_t = jax.lax.dynamic_slice(addend, (t * B, 0), (B, H2))
            return superstep(s_carry, add_t)
        s = jax.lax.fori_loop(1, S, body, s, unroll=8)

    # Trailing half-step: h1_{S-1} lands in the right half of s; the dead
    # left half is annihilated by the zero rows of wlinsq below.
    s = superstep(s, b1pad)

    # Classifier head: logits appear in columns [0:C).
    logits = jnp.dot(s, wlinsq, preferred_element_type=f32) + blinpad
    out_ref[...] = logits[:, 0:C].astype(out_ref.dtype)


def prepare_params(params):
    """One-time packing of all RNN + Linear parameters into a single slab.

    Slab layout (f32, width 2H, all row offsets 8-aligned):
      rows [0, Ep)           : [W_ih0^T | 0]                       (Ep, 2H)
      rows [Ep, Ep+2H)       : [[W_hh0^T, W_ih1^T], [0, W_hh1^T]]  (2H, 2H)
      rows [Ep+2H, Ep+4H)    : W_lin^T embedded at rows[H:], cols[:C]
      rows [Ep+4H, Ep+4H+8)  : bias rows: [b0|b1], [0|b1], [b_lin|0], zeros
    """
    f32 = jnp.float32
    H = params["w_hh0"].shape[0]
    E = params["w_ih0"].shape[1]
    C = params["w_lin"].shape[0]
    H2 = 2 * H
    Ep = _round_up(E, 8)
    assert H2 % 8 == 0, "hidden_size must be a multiple of 4"
    assert C <= H2, "num_classes must fit in 2*hidden_size lanes"

    wih0pad = jnp.zeros((Ep, H2), f32).at[:E, :H].set(params["w_ih0"].T.astype(f32))

    wbig = jnp.zeros((H2, H2), f32)
    wbig = wbig.at[:H, :H].set(params["w_hh0"].T.astype(f32))
    wbig = wbig.at[:H, H:].set(params["w_ih1"].T.astype(f32))
    wbig = wbig.at[H:, H:].set(params["w_hh1"].T.astype(f32))

    wlinsq = jnp.zeros((H2, H2), f32).at[H:, :C].set(params["w_lin"].T.astype(f32))

    b0 = (params["b_ih0"] + params["b_hh0"]).astype(f32)
    b1 = (params["b_ih1"] + params["b_hh1"]).astype(f32)
    bias = jnp.zeros((8, H2), f32)
    bias = bias.at[0, :H].set(b0).at[0, H:].set(b1)          # [b0 | b1]
    bias = bias.at[1, H:].set(b1)                            # [0  | b1]
    bias = bias.at[2, :C].set(params["b_lin"].astype(f32))   # [b_lin | 0]

    return jnp.concatenate([wih0pad, wbig, wlinsq, bias], axis=0)


@functools.partial(jax.jit, static_argnames=("num_classes",))
def rnn_imdb_forward(x, slab, *, num_classes):
    """x: (batch, seq, embed) f32; slab from prepare_params. -> (batch, classes)."""
    B, S, E = x.shape
    H2 = slab.shape[1]
    H = H2 // 2
    e_pad = slab.shape[0] - 2 * H2 - 8

    # Time-major + flattened so the layer-0 projection is one matmul.
    x_flat = jnp.transpose(x, (1, 0, 2)).reshape(S * B, E)
    if e_pad != E:
        x_flat = jnp.pad(x_flat, ((0, 0), (0, e_pad - E)))

    kernel = functools.partial(
        rnn_wavefront_kernel, seq_len=S, batch=B, e_pad=e_pad,
        hidden=H, classes=num_classes)
    vmem = pl.BlockSpec(memory_space=pltpu.MemorySpace.VMEM)

    return pl.pallas_call(
        kernel,
        out_shape=jax.ShapeDtypeStruct((B, num_classes), jnp.float32),
        in_specs=[vmem, vmem],
        out_specs=vmem,
    )(x_flat, slab)


def rnn_imdb_reference(x, params):
    """Pure-JAX reference matching torch.nn.RNN(num_layers=2, tanh) + Linear."""
    B, S, E = x.shape
    H = params["w_hh0"].shape[0]
    h0 = jnp.zeros((B, H), jnp.float32)
    h1 = jnp.zeros((B, H), jnp.float32)
    for t in range(S):
        xt = x[:, t, :]
        h0 = jnp.tanh(xt @ params["w_ih0"].T + params["b_ih0"]
                      + h0 @ params["w_hh0"].T + params["b_hh0"])
        h1 = jnp.tanh(h0 @ params["w_ih1"].T + params["b_ih1"]
                      + h1 @ params["w_hh1"].T + params["b_hh1"])
    return h1 @ params["w_lin"].T + params["b_lin"]


def init_params(key, embedding_dim, hidden_size, num_classes):
    """Deterministic init mirroring PyTorch's U(-1/sqrt(H), 1/sqrt(H))."""
    H, E, C = hidden_size, embedding_dim, num_classes
    k = 1.0 / jnp.sqrt(jnp.float32(H))
    keys = jax.random.split(key, 10)
    u = lambda kk, shape: jax.random.uniform(kk, shape, jnp.float32, -k, k)
    return {
        "w_ih0": u(keys[0], (H, E)), "w_hh0": u(keys[1], (H, H)),
        "b_ih0": u(keys[2], (H,)),   "b_hh0": u(keys[3], (H,)),
        "w_ih1": u(keys[4], (H, H)), "w_hh1": u(keys[5], (H, H)),
        "b_ih1": u(keys[6], (H,)),   "b_hh1": u(keys[7], (H,)),
        "w_lin": u(keys[8], (C, H)), "b_lin": u(keys[9], (C,)),
    }


if __name__ == "__main__":
    # Small shapes consistent with the module's forward.
    batch, seq_len, embedding_dim, hidden_size, num_classes = 8, 8, 32, 32, 4

    key = jax.random.PRNGKey(0)
    kx, kp = jax.random.split(key)
    x = jax.random.normal(kx, (batch, seq_len, embedding_dim), jnp.float32)
    params = init_params(kp, embedding_dim, hidden_size, num_classes)

    # One-time weight packing (done at init, NOT per forward call).
    slab = jax.block_until_ready(prepare_params(params))

    out = rnn_imdb_forward(x, slab, num_classes=num_classes)
    out = jax.block_until_ready(out)

    ref = rnn_imdb_reference(x, params)
    assert out.shape == (batch, num_classes)
    err = jnp.max(jnp.abs(out - ref))
    assert jnp.allclose(out, ref, atol=2e-5, rtol=2e-5), f"max err = {err}"

    print("KERNEL_OK")
</pallas_src>

<mosaic_0001>
module attributes {stable_mosaic.version = 11 : i64} {
  func.func @rnn_wavefront_kernel(%arg0: memref<64x32xf32, #tpu.memory_space<vmem>>, %arg1: memref<168x64xf32, #tpu.memory_space<vmem>>, %arg2: memref<8x4xf32, #tpu.memory_space<vmem>>) attributes {dimension_semantics = [], scalar_prefetch = 0 : i64, scratch_operands = 0 : i64, tpu.core_type = #tpu.core_type<tc>} {
    %c0 = arith.constant 0 : index
    %c0_0 = arith.constant 0 : index
    %0 = vector.load %arg1[%c0, %c0_0] : memref<168x64xf32, #tpu.memory_space<vmem>>, vector<32x64xf32>
    %c32 = arith.constant 32 : index
    %c0_1 = arith.constant 0 : index
    %1 = vector.load %arg1[%c32, %c0_1] : memref<168x64xf32, #tpu.memory_space<vmem>>, vector<64x64xf32>
    %c96 = arith.constant 96 : index
    %c0_2 = arith.constant 0 : index
    %2 = vector.load %arg1[%c96, %c0_2] : memref<168x64xf32, #tpu.memory_space<vmem>>, vector<64x64xf32>
    %c160 = arith.constant 160 : index
    %c0_3 = arith.constant 0 : index
    %3 = vector.load %arg1[%c160, %c0_3] : memref<168x64xf32, #tpu.memory_space<vmem>>, vector<8x64xf32>
    %4 = vector.extract_strided_slice %3 {offsets = [0, 0], sizes = [1, 64], strides = [1, 1]} : vector<8x64xf32> to vector<1x64xf32>
    %5 = vector.extract_strided_slice %3 {offsets = [1, 0], sizes = [1, 64], strides = [1, 1]} : vector<8x64xf32> to vector<1x64xf32>
    %6 = vector.extract_strided_slice %3 {offsets = [2, 0], sizes = [1, 64], strides = [1, 1]} : vector<8x64xf32> to vector<1x64xf32>
    %c0_4 = arith.constant 0 : index
    %c0_5 = arith.constant 0 : index
    %7 = vector.load %arg0[%c0_4, %c0_5] : memref<64x32xf32, #tpu.memory_space<vmem>>, vector<64x32xf32>
    %cst = arith.constant dense<0.000000e+00> : vector<64x64xf32>
    %8 = tpu.matmul %7, %0, %cst {dimension_numbers = #tpu.dot_dimension_numbers<[1], [0], [0], [1], [0, 0, 1, 1], [], []>} : vector<64x32xf32>, vector<32x64xf32>, vector<64x64xf32> -> vector<64x64xf32>
    %9 = vector.broadcast %4 : vector<1x64xf32> to vector<64x64xf32>
    %10 = arith.addf %8, %9 : vector<64x64xf32>
    %11 = vector.extract_strided_slice %10 {offsets = [0, 0], sizes = [8, 64], strides = [1, 1]} : vector<64x64xf32> to vector<8x64xf32>
    %12 = vector.broadcast %5 : vector<1x64xf32> to vector<8x64xf32>
    %13 = arith.subf %11, %12 : vector<8x64xf32>
    %14 = math.tanh %13 : vector<8x64xf32>
    %15 = vector.extract_strided_slice %10 {offsets = [8, 0], sizes = [8, 64], strides = [1, 1]} : vector<64x64xf32> to vector<8x64xf32>
    %cst_6 = arith.constant dense<0.000000e+00> : vector<8x64xf32>
    %16 = tpu.matmul %14, %1, %cst_6 {dimension_numbers = #tpu.dot_dimension_numbers<[1], [0], [0], [1], [0, 0, 1, 1], [], []>} : vector<8x64xf32>, vector<64x64xf32>, vector<8x64xf32> -> vector<8x64xf32>
    %17 = arith.addf %16, %15 : vector<8x64xf32>
    %18 = math.tanh %17 : vector<8x64xf32>
    %19 = vector.extract_strided_slice %10 {offsets = [16, 0], sizes = [8, 64], strides = [1, 1]} : vector<64x64xf32> to vector<8x64xf32>
    %cst_7 = arith.constant dense<0.000000e+00> : vector<8x64xf32>
    %20 = tpu.matmul %18, %1, %cst_7 {dimension_numbers = #tpu.dot_dimension_numbers<[1], [0], [0], [1], [0, 0, 1, 1], [], []>} : vector<8x64xf32>, vector<64x64xf32>, vector<8x64xf32> -> vector<8x64xf32>
    %21 = arith.addf %20, %19 : vector<8x64xf32>
    %22 = math.tanh %21 : vector<8x64xf32>
    %23 = vector.extract_strided_slice %10 {offsets = [24, 0], sizes = [8, 64], strides = [1, 1]} : vector<64x64xf32> to vector<8x64xf32>
    %cst_8 = arith.constant dense<0.000000e+00> : vector<8x64xf32>
    %24 = tpu.matmul %22, %1, %cst_8 {dimension_numbers = #tpu.dot_dimension_numbers<[1], [0], [0], [1], [0, 0, 1, 1], [], []>} : vector<8x64xf32>, vector<64x64xf32>, vector<8x64xf32> -> vector<8x64xf32>
    %25 = arith.addf %24, %23 : vector<8x64xf32>
    %26 = math.tanh %25 : vector<8x64xf32>
    %27 = vector.extract_strided_slice %10 {offsets = [32, 0], sizes = [8, 64], strides = [1, 1]} : vector<64x64xf32> to vector<8x64xf32>
    %cst_9 = arith.constant dense<0.000000e+00> : vector<8x64xf32>
    %28 = tpu.matmul %26, %1, %cst_9 {dimension_numbers = #tpu.dot_dimension_numbers<[1], [0], [0], [1], [0, 0, 1, 1], [], []>} : vector<8x64xf32>, vector<64x64xf32>, vector<8x64xf32> -> vector<8x64xf32>
    %29 = arith.addf %28, %27 : vector<8x64xf32>
    %30 = math.tanh %29 : vector<8x64xf32>
    %31 = vector.extract_strided_slice %10 {offsets = [40, 0], sizes = [8, 64], strides = [1, 1]} : vector<64x64xf32> to vector<8x64xf32>
    %cst_10 = arith.constant dense<0.000000e+00> : vector<8x64xf32>
    %32 = tpu.matmul %30, %1, %cst_10 {dimension_numbers = #tpu.dot_dimension_numbers<[1], [0], [0], [1], [0, 0, 1, 1], [], []>} : vector<8x64xf32>, vector<64x64xf32>, vector<8x64xf32> -> vector<8x64xf32>
    %33 = arith.addf %32, %31 : vector<8x64xf32>
    %34 = math.tanh %33 : vector<8x64xf32>
    %35 = vector.extract_strided_slice %10 {offsets = [48, 0], sizes = [8, 64], strides = [1, 1]} : vector<64x64xf32> to vector<8x64xf32>
    %cst_11 = arith.constant dense<0.000000e+00> : vector<8x64xf32>
    %36 = tpu.matmul %34, %1, %cst_11 {dimension_numbers = #tpu.dot_dimension_numbers<[1], [0], [0], [1], [0, 0, 1, 1], [], []>} : vector<8x64xf32>, vector<64x64xf32>, vector<8x64xf32> -> vector<8x64xf32>
    %37 = arith.addf %36, %35 : vector<8x64xf32>
    %38 = math.tanh %37 : vector<8x64xf32>
    %39 = vector.extract_strided_slice %10 {offsets = [56, 0], sizes = [8, 64], strides = [1, 1]} : vector<64x64xf32> to vector<8x64xf32>
    %cst_12 = arith.constant dense<0.000000e+00> : vector<8x64xf32>
    %40 = tpu.matmul %38, %1, %cst_12 {dimension_numbers = #tpu.dot_dimension_numbers<[1], [0], [0], [1], [0, 0, 1, 1], [], []>} : vector<8x64xf32>, vector<64x64xf32>, vector<8x64xf32> -> vector<8x64xf32>
    %41 = arith.addf %40, %39 : vector<8x64xf32>
    %42 = math.tanh %41 : vector<8x64xf32>
    %cst_13 = arith.constant dense<0.000000e+00> : vector<8x64xf32>
    %43 = tpu.matmul %42, %1, %cst_13 {dimension_numbers = #tpu.dot_dimension_numbers<[1], [0], [0], [1], [0, 0, 1, 1], [], []>} : vector<8x64xf32>, vector<64x64xf32>, vector<8x64xf32> -> vector<8x64xf32>
    %44 = vector.broadcast %5 : vector<1x64xf32> to vector<8x64xf32>
    %45 = arith.addf %43, %44 : vector<8x64xf32>
    %46 = math.tanh %45 : vector<8x64xf32>
    %cst_14 = arith.constant dense<0.000000e+00> : vector<8x64xf32>
    %47 = tpu.matmul %46, %2, %cst_14 {dimension_numbers = #tpu.dot_dimension_numbers<[1], [0], [0], [1], [0, 0, 1, 1], [], []>} : vector<8x64xf32>, vector<64x64xf32>, vector<8x64xf32> -> vector<8x64xf32>
    %48 = vector.broadcast %6 : vector<1x64xf32> to vector<8x64xf32>
    %49 = arith.addf %47, %48 : vector<8x64xf32>
    %50 = vector.extract_strided_slice %49 {offsets = [0, 0], sizes = [8, 4], strides = [1, 1]} : vector<8x64xf32> to vector<8x4xf32>
    %c0_15 = arith.constant 0 : index
    %c0_16 = arith.constant 0 : index
    %51 = vector.load %arg2[%c0_15, %c0_16] : memref<8x4xf32, #tpu.memory_space<vmem>>, vector<8x4xf32>
    tpu.vector_store %arg2[%c0_15, %c0_16], %50 {strides = array<i32>} : memref<8x4xf32, #tpu.memory_space<vmem>>, vector<8x4xf32>,
    return
  }
}

</mosaic_0001>

<bundles_post_ra>
// kernel: rnn_imdb_forward.1
= control target key start
LH: loop header
LB: loop body
LE: loop exit
PB: predicated region body
PF: predicated region fallthrough
CT: control target
= control target key end

     0   :  { %vm44_vm0 = vcmask 261120   ;;  %v1294_v11 = vmov 0.0|0.0   ;;  %vm1295_vm1 = vmmov 0   ;;  %v1296_v20 = vmov 0.0   ;;  %s1543_s1 = inlined_call_operand.vmem [shape: f32[168,64], index: 1, kind: input, shape index: {}]   ;;  %s1544_s0 = inlined_call_operand.vmem [shape: f32[64,32], index: 0, kind: input, shape index: {}]   ;;  %s1545_s2 = inlined_call_operand.vmem [shape: f32[8,4], index: 2, kind: output, shape index: {}]  }
   0x1   :  { %v11_v0 = vld [vmem:[%s1543_s1] sm:$0xff]  ;;  %v12_v1 = vld [vmem:[%s1543_s1 + $0x8] sm:$0xff]  ;;  %v13_v2 = vld [vmem:[%s1543_s1 + $0x10] sm:$0xff]  ;;  %1165 = vmatprep.subr.bf16.mxu1 %v1294_v11  ;;  %1002 = vmatprep.mubr.msk.f32.mxu1 %vm1295_vm1, %v1296_v20  ;;  %v40_v23 = vlaneseq  ;;  %vm180_vm2 = vcmask 523264   ;;  %vm850_vm3 = vcmask 31744  }
   0x2   :  { %v1157_v3 = vpack.c.bf16 %v12_v1, %v11_v0  ;;  %v14_v4 = vld [vmem:[%s1543_s1 + $0x18] sm:$0xff]  ;;  %v32_v5 = vld [vmem:[%s1544_s0] sm:$0xff]  ;;  %v33_v7 = vld [vmem:[%s1544_s0 + $0x8] sm:$0xff] }
   0x3   :  { %v1161_v6 = vpack.c.bf16 %v14_v4, %v13_v2  ;;  %974 = vmatprep.mubr.msk.f32.mxu0 %vm44_vm0, %v32_v5  ;;  %v15_v8 = vld [vmem:[%s1543_s1 + $0x20] sm:$0xff]  ;;  %v16_v9 = vld [vmem:[%s1543_s1 + $0x28] sm:$0xff]  ;;  %v17_v12 = vld [vmem:[%s1543_s1 + $0x30] sm:$0xff]  ;;  %v1388_v24 = vshrl.u32 %v40_v23, 7 }
   0x4   :  { %1158 = vmatprep.subr.bf16.mxu0 %v1157_v3  ;;  %v1338_v10 = vpack.c.bf16 %v16_v9, %v15_v8  ;;  %v18_v13 = vld [vmem:[%s1543_s1 + $0x38] sm:$0xff]  ;;  %v19_v15 = vld [vmem:[%s1543_s1 + $0x40] sm:$0xff]  ;;  %v20_v16 = vld [vmem:[%s1543_s1 + $0x48] sm:$0xff] }
   0x5   :  { %1160 = vmatpush3.bf16.msra.mxu0 %v1157_v3  ;;  %v1352_v14 = vpack.c.bf16 %v18_v13, %v17_v12  ;;  %v1363_v17 = vpack.c.bf16 %v20_v16, %v19_v15  ;;  %v21_v18 = vld [vmem:[%s1543_s1 + $0x50] sm:$0xff]  ;;  %v22_v19 = vld [vmem:[%s1543_s1 + $0x58] sm:$0xff]  ;;  %v42_v25 = vsub.s32 0, %v1388_v24  ;;  %v1394_v26 = vld [vmem:[%s1543_s1 + $0xa0] sm:$0xff]  ;;  %v176_v27 = vsub.s32 1, %v1388_v24 }
   0x6   :  { %1162 = vmatprep.subr.bf16.mxu0 %v1161_v6  ;;  %1167 = vmatpush3.bf16.msra.mxu1 %v1338_v10  ;;  %v1375_v21 = vpack.c.bf16 %v22_v19, %v21_v18  ;;  %v34_v22 = vld [vmem:[%s1544_s0 + $0x10] sm:$0xff]  ;;  %v35_v35 = vld [vmem:[%s1544_s0 + $0x18] sm:$0xff]  ;;  %v36_v36 = vld [vmem:[%s1544_s0 + $0x20] sm:$0xff] }
   0x7   :  { %1168 = vmatprep.subr.bf16.mxu1 %v1294_v11  ;;  %v1398_v28 = vrot.slane %v1394_v26, %v42_v25  ;;  %v1401_v30 = vrot.slane %v1394_v26, %v176_v27  ;;  %v37_v37 = vld [vmem:[%s1544_s0 + $0x28] sm:$0xff]  ;;  %v38_v38 = vld [vmem:[%s1544_s0 + $0x30] sm:$0xff]  ;;  %v39_v39 = vld [vmem:[%s1544_s0 + $0x38] sm:$0xff] }
   0x8   :  { %v23_v13 = vld [vmem:[%s1543_s1 + $0x60] sm:$0xff]  ;;  %v28_v27 = vld [vmem:[%s1543_s1 + $0x88] sm:$0xff] }
   0x9   :  { %1164 = vmatpush3.bf16.msra.mxu0 %v1161_v6  ;;  %v27_v25 = vld [vmem:[%s1543_s1 + $0x80] sm:$0xff] }
   0xa   :  { %1177 = vmatprep.subr.bf16.mxu0 %v1294_v11  ;;  %1170 = vmatpush3.bf16.msra.mxu1 %v1352_v14 }
   0xb   :  { %1171 = vmatprep.subr.bf16.mxu1 %v1294_v11 }
   0xc   :  { %975 = vmatmul.mubr.msk.f32.vlgmr.msra.gmra.mrb[0].mxu0 %vm44_vm0, %v33_v7 }
   0xd   :  { %1179 = vmatpush3.bf16.msra.mxu0 %v1338_v10  ;;  %977 = vmatprep.mubr.msk.f32.mxu0 %vm44_vm0, %v34_v22  ;;  %v26_v22 = vld [vmem:[%s1543_s1 + $0x78] sm:$0xff] }
   0xe   :  { %1180 = vmatprep.subr.bf16.mxu0 %v1294_v11  ;;  %1173 = vmatpush3.bf16.msra.mxu1 %v1363_v17 }
   0xf   :  { %1174 = vmatprep.subr.bf16.mxu1 %v1294_v11 }
  0x10   :  { %978 = vmatmul.mubr.msk.f32.gmra.mrb[2].mxu0 %vm44_vm0, %v35_v35 }
  0x11   :  { %1182 = vmatpush3.bf16.msra.mxu0 %v1352_v14  ;;  %980 = vmatprep.mubr.msk.f32.mxu0 %vm44_vm0, %v36_v36 }
  0x12   :  { %1183 = vmatprep.subr.bf16.mxu0 %v1294_v11  ;;  %1176 = vmatpush3.bf16.msra.mxu1 %v1375_v21 }
  0x13   :  { %1189 = vmatprep.subr.bf16.mxu1 %v1294_v11 }
  0x14   :  { %981 = vmatmul.mubr.msk.f32.gmra.mrb[4].mxu0 %vm44_vm0, %v37_v37  ;;  %v775_v37 = vsub.s32 2, %v1388_v24 }
  0x15   :  { %1185 = vmatpush3.bf16.msra.mxu0 %v1363_v17  ;;  %983 = vmatprep.mubr.msk.f32.mxu0 %vm44_vm0, %v38_v38 }
  0x16   :  { %1186 = vmatprep.subr.bf16.mxu0 %v1294_v11  ;;  %v776_v38 = vrot.slane %v1394_v26, %v775_v37 }
  0x18   :  { %984 = vmatmul.mubr.msk.f32.gmra.mrb[6].mxu0 %vm44_vm0, %v39_v39 }
  0x19   :  { %1188 = vmatpush3.bf16.msra.mxu0 %v1375_v21  ;;  %1021 = vmatprep.mubr.msk.f32.mxu0 %vm1295_vm1, %v1296_v20 }
  0x1a   :  { %1201 = vmatprep.subr.bf16.mxu0 %v1294_v11 }
  0xdf   :  { %v976_v29 = vpop.f32.mrb[0].mxu0 }
  0xe0   :  { %v135_v31 = vpop.f32.mrb[1].mxu0  ;;  %v141_v40 = vadd.f32 %v976_v29, %v1398_v28  ;;  %v29_v29 = vld [vmem:[%s1543_s1 + $0x90] sm:$0xff] }
  0xe1   :  { %v136_v32 = vadd.f32 %v135_v31, %v1398_v28  ;;  %v30_v31 = vld [vmem:[%s1543_s1 + $0x98] sm:$0xff] }
  0xe3   :  { %v178_v33 = vsub.f32 %v136_v32, %v1401_v30  ;;  %v979_v45 = vpop.f32.mrb[2].mxu0  ;;  %v1271_v32 = vpack.c.bf16 %v30_v31, %v29_v29 }
  0xe4   :  { %v145_v46 = vpop.f32.mrb[3].mxu0  ;;  %v151_v56 = vadd.f32 %v979_v45, %v1398_v28 }
  0xe5   :  { %1276 = vtanh.f32 %v178_v33  ;;  %v146_v51 = vadd.f32 %v145_v46, %v1398_v28 }
  0xe7   :  { %v982_v47 = vpop.f32.mrb[4].mxu0 }
  0xe8   :  { %v155_v48 = vpop.f32.mrb[5].mxu0  ;;  %v161_v2 = vadd.f32 %v982_v47, %v1398_v28 }
  0xe9   :  { %v156_v61 = vadd.f32 %v155_v48, %v1398_v28 }
  0xeb   :  { %v1450_v49 = vpop.f32.mrb[6].mxu0 }
  0xec   :  { %v1452_v50 = vpop.f32.mrb[7].mxu0  ;;  %v171_v16 = vadd.f32 %v1450_v49, %v1398_v28 }
  0xed   :  { %v166_v7 = vadd.f32 %v1452_v50, %v1398_v28  ;;  %v1268_v28 = vpack.c.bf16 %v28_v27, %v27_v25 }
  0xef   :  { %v1277_v34 = vpop.eup %1276 }
  0xf0   :  { %1003 = vmatmul.mubr.msk.f32.vlgmr.msra.gmra.mrb[0].mxu1 %vm180_vm2, %v1277_v34 }
  0xf1   :  { %1191 = vmatpush3.bf16.msra.mxu1 %v1338_v10  ;;  %1040 = vmatprep.mubr.msk.f32.mxu1 %vm1295_vm1, %v1296_v20 }
  0xf2   :  { %1192 = vmatprep.subr.bf16.mxu1 %v1294_v11 }
  0xf5   :  { %1194 = vmatpush3.bf16.msra.mxu1 %v1352_v14 }
  0xf6   :  { %1195 = vmatprep.subr.bf16.mxu1 %v1294_v11 }
  0xf9   :  { %1197 = vmatpush3.bf16.msra.mxu1 %v1363_v17 }
  0xfa   :  { %1198 = vmatprep.subr.bf16.mxu1 %v1294_v11 }
  0xfd   :  { %1200 = vmatpush3.bf16.msra.mxu1 %v1375_v21 }
  0xfe   :  { %1213 = vmatprep.subr.bf16.mxu1 %v1294_v11 }
 0x1c3   :  { %v250_v41 = vpop.f32.mrb[0].mxu1 }
 0x1c4   :  { %v251_v42 = vadd.f32 %v250_v41, %v141_v40  ;;  %v1004_v43 = vpop.f32.mrb[1].mxu1 }
 0x1c6   :  { %1278 = vtanh.f32 %v251_v42 }
 0x1d0   :  { %v1279_v44 = vpop.eup %1278 }
 0x1d1   :  { %1022 = vmatmul.mubr.msk.f32.vlgmr.msra.gmra.mrb[8].mxu0 %vm180_vm2, %v1279_v44 }
 0x1d2   :  { %1203 = vmatpush3.bf16.msra.mxu0 %v1338_v10  ;;  %1059 = vmatprep.mubr.msk.f32.mxu0 %vm1295_vm1, %v1296_v20 }
 0x1d3   :  { %1204 = vmatprep.subr.bf16.mxu0 %v1294_v11 }
 0x1d6   :  { %1206 = vmatpush3.bf16.msra.mxu0 %v1352_v14 }
 0x1d7   :  { %1207 = vmatprep.subr.bf16.mxu0 %v1294_v11 }
 0x1da   :  { %1209 = vmatpush3.bf16.msra.mxu0 %v1363_v17 }
 0x1db   :  { %1210 = vmatprep.subr.bf16.mxu0 %v1294_v11 }
 0x1de   :  { %1212 = vmatpush3.bf16.msra.mxu0 %v1375_v21 }
 0x1df   :  { %1225 = vmatprep.subr.bf16.mxu0 %v1294_v11 }
 0x2a4   :  { %v324_v52 = vpop.f32.mrb[8].mxu0 }
 0x2a5   :  { %v325_v53 = vadd.f32 %v324_v52, %v146_v51  ;;  %v1023_v54 = vpop.f32.mrb[9].mxu0 }
 0x2a7   :  { %1280 = vtanh.f32 %v325_v53 }
 0x2b1   :  { %v1281_v55 = vpop.eup %1280 }
 0x2b2   :  { %1041 = vmatmul.mubr.msk.f32.vlgmr.msra.gmra.mrb[2].mxu1 %vm180_vm2, %v1281_v55 }
 0x2b3   :  { %1215 = vmatpush3.bf16.msra.mxu1 %v1338_v10  ;;  %1078 = vmatprep.mubr.msk.f32.mxu1 %vm1295_vm1, %v1296_v20 }
 0x2b4   :  { %1216 = vmatprep.subr.bf16.mxu1 %v1294_v11 }
 0x2b7   :  { %1218 = vmatpush3.bf16.msra.mxu1 %v1352_v14 }
 0x2b8   :  { %1219 = vmatprep.subr.bf16.mxu1 %v1294_v11 }
 0x2bb   :  { %1221 = vmatpush3.bf16.msra.mxu1 %v1363_v17 }
 0x2bc   :  { %1222 = vmatprep.subr.bf16.mxu1 %v1294_v11 }
 0x2bf   :  { %1224 = vmatpush3.bf16.msra.mxu1 %v1375_v21 }
 0x2c0   :  { %1237 = vmatprep.subr.bf16.mxu1 %v1294_v11 }
 0x385   :  { %v398_v57 = vpop.f32.mrb[2].mxu1 }
 0x386   :  { %v399_v58 = vadd.f32 %v398_v57, %v151_v56  ;;  %v1042_v59 = vpop.f32.mrb[3].mxu1 }
 0x388   :  { %1282 = vtanh.f32 %v399_v58 }
 0x392   :  { %v1283_v60 = vpop.eup %1282 }
 0x393   :  { %1060 = vmatmul.mubr.msk.f32.vlgmr.msra.gmra.mrb[10].mxu0 %vm180_vm2, %v1283_v60 }
 0x394   :  { %1227 = vmatpush3.bf16.msra.mxu0 %v1338_v10  ;;  %1097 = vmatprep.mubr.msk.f32.mxu0 %vm1295_vm1, %v1296_v20 }
 0x395   :  { %1228 = vmatprep.subr.bf16.mxu0 %v1294_v11 }
 0x398   :  { %1230 = vmatpush3.bf16.msra.mxu0 %v1352_v14 }
 0x399   :  { %1231 = vmatprep.subr.bf16.mxu0 %v1294_v11 }
 0x39c   :  { %1233 = vmatpush3.bf16.msra.mxu0 %v1363_v17 }
 0x39d   :  { %1234 = vmatprep.subr.bf16.mxu0 %v1294_v11 }
 0x3a0   :  { %1236 = vmatpush3.bf16.msra.mxu0 %v1375_v21 }
 0x3a1   :  { %1249 = vmatprep.subr.bf16.mxu0 %v1294_v11 }
 0x466   :  { %v472_v62 = vpop.f32.mrb[10].mxu0 }
 0x467   :  { %v473_v63 = vadd.f32 %v472_v62, %v156_v61  ;;  %v1061_v0 = vpop.f32.mrb[11].mxu0 }
 0x469   :  { %1284 = vtanh.f32 %v473_v63 }
 0x473   :  { %v1285_v1 = vpop.eup %1284 }
 0x474   :  { %1079 = vmatmul.mubr.msk.f32.vlgmr.msra.gmra.mrb[4].mxu1 %vm180_vm2, %v1285_v1 }
 0x475   :  { %1239 = vmatpush3.bf16.msra.mxu1 %v1338_v10  ;;  %1116 = vmatprep.mubr.msk.f32.mxu1 %vm1295_vm1, %v1296_v20 }
 0x476   :  { %1240 = vmatprep.subr.bf16.mxu1 %v1294_v11 }
 0x479   :  { %1242 = vmatpush3.bf16.msra.mxu1 %v1352_v14 }
 0x47a   :  { %1243 = vmatprep.subr.bf16.mxu1 %v1294_v11 }
 0x47d   :  { %1245 = vmatpush3.bf16.msra.mxu1 %v1363_v17 }
 0x47e   :  { %1246 = vmatprep.subr.bf16.mxu1 %v1294_v11 }
 0x481   :  { %1248 = vmatpush3.bf16.msra.mxu1 %v1375_v21 }
 0x482   :  { %1261 = vmatprep.subr.bf16.mxu1 %v1294_v11 }
 0x547   :  { %v546_v3 = vpop.f32.mrb[4].mxu1 }
 0x548   :  { %v547_v4 = vadd.f32 %v546_v3, %v161_v2  ;;  %v1080_v5 = vpop.f32.mrb[5].mxu1 }
 0x54a   :  { %1286 = vtanh.f32 %v547_v4 }
 0x554   :  { %v1287_v6 = vpop.eup %1286 }
 0x555   :  { %1098 = vmatmul.mubr.msk.f32.vlgmr.msra.gmra.mrb[12].mxu0 %vm180_vm2, %v1287_v6 }
 0x556   :  { %1251 = vmatpush3.bf16.msra.mxu0 %v1338_v10  ;;  %1135 = vmatprep.mubr.msk.f32.mxu0 %vm1295_vm1, %v1296_v20 }
 0x557   :  { %1252 = vmatprep.subr.bf16.mxu0 %v1294_v11 }
 0x55a   :  { %1254 = vmatpush3.bf16.msra.mxu0 %v1352_v14  ;;  %v24_v14 = vld [vmem:[%s1543_s1 + $0x68] sm:$0xff] }
 0x55b   :  { %1255 = vmatprep.subr.bf16.mxu0 %v1294_v11  ;;  %v1262_v15 = vpack.c.bf16 %v24_v14, %v23_v13 }
 0x55e   :  { %1257 = vmatpush3.bf16.msra.mxu0 %v1363_v17 }
 0x55f   :  { %1258 = vmatprep.subr.bf16.mxu0 %v1294_v11 }
 0x562   :  { %1260 = vmatpush3.bf16.msra.mxu0 %v1375_v21  ;;  %v25_v21 = vld [vmem:[%s1543_s1 + $0x70] sm:$0xff] }
 0x563   :  { %v1265_v23 = vpack.c.bf16 %v26_v22, %v25_v21 }
 0x628   :  { %v620_v8 = vpop.f32.mrb[12].mxu0 }
 0x629   :  { %v621_v9 = vadd.f32 %v620_v8, %v166_v7  ;;  %v1099_v10 = vpop.f32.mrb[13].mxu0 }
 0x62b   :  { %1288 = vtanh.f32 %v621_v9 }
 0x635   :  { %v1289_v12 = vpop.eup %1288 }
 0x636   :  { %1117 = vmatmul.mubr.msk.f32.vlgmr.msra.gmra.mrb[6].mxu1 %vm180_vm2, %v1289_v12 }
 0x637   :  { %1154 = vmatprep.mubr.msk.f32.mxu1 %vm1295_vm1, %v1296_v20  ;;  %1263 = vmatpush3.bf16.msra.mxu1 %v1262_v15 }
 0x638   :  { %1264 = vmatprep.subr.bf16.mxu1 %v1294_v11 }
 0x63b   :  { %1266 = vmatpush3.bf16.msra.mxu1 %v1265_v23 }
 0x63c   :  { %1267 = vmatprep.subr.bf16.mxu1 %v1294_v11 }
 0x63f   :  { %1269 = vmatpush3.bf16.msra.mxu1 %v1268_v28 }
 0x640   :  { %1270 = vmatprep.subr.bf16.mxu1 %v1294_v11 }
 0x643   :  { %1272 = vmatpush3.bf16.msra.mxu1 %v1271_v32 }
 0x709   :  { %v694_v17 = vpop.f32.mrb[6].mxu1 }
 0x70a   :  { %v695_v18 = vadd.f32 %v694_v17, %v171_v16  ;;  %v1118_v19 = vpop.f32.mrb[7].mxu1 }
 0x70c   :  { %1290 = vtanh.f32 %v695_v18 }
 0x716   :  { %v1291_v20 = vpop.eup %1290 }
 0x717   :  { %1136 = vmatmul.mubr.msk.f32.vlgmr.msra.gmra.mrb[14].mxu0 %vm180_vm2, %v1291_v20 }
 0x7ea   :  { %v768_v33 = vpop.f32.mrb[14].mxu0 }
 0x7eb   :  { %v769_v34 = vadd.f32 %v768_v33, %v1401_v30  ;;  %v1137_v35 = vpop.f32.mrb[15].mxu0 }
 0x7ed   :  { %1292 = vtanh.f32 %v769_v34 }
 0x7f7   :  { %v1293_v36 = vpop.eup %1292 }
 0x7f8   :  { %1155 = vmatmul.mubr.msk.f32.vlgmr.msra.gmra.mrb[8].mxu1 %vm180_vm2, %v1293_v36 }
 0x8cb   :  { %v846_v39 = vpop.f32.mrb[8].mxu1 }
 0x8cc   :  { %v847_v40 = vadd.f32 %v846_v39, %v776_v38  ;;  %v1156_v41 = vpop.f32.mrb[9].mxu1 }
 0x8ce   :  { %851 = vst.msk [vmem:[%s1545_s2] sm:$0xff] %vm850_vm3, %v847_v40 }

</bundles_post_ra>
